<compile_context>
chip_gen: v5e
topology: v5e:2x2
jax: 0.10.0
libtpu: 0.0.40
codegen_flags: <defaults>
</compile_context>

<pallas_src>
import jax
import jax.numpy as jnp
from jax.experimental import pallas as pl
from jax.experimental.pallas import tpu as pltpu


def _round_up(n, m):
    return (n + m - 1) // m * m


def _cdiv(a, b):
    return (a + b - 1) // b


def mlp_kernel(x_ref,
               w1_ref, b1_ref,
               w2_ref, b2_ref,
               w3_ref, b3_ref,
               w4_ref, b4_ref,
               w5_ref, b5_ref,
               o_ref):
    # Cast x to bf16 in-kernel (a few VPU ops hidden under MXU work) instead of a
    # separate wrapper-side XLA cast that re-reads/re-writes x through HBM.
    x = x_ref[...].astype(jnp.bfloat16)

    # Layers 1-4: bf16 MXU matmuls, f32 accumulate + bias-add + ReLU (v5e-safe epilogue).
    h = jnp.dot(x, w1_ref[...], preferred_element_type=jnp.float32) + b1_ref[...]
    h = jnp.maximum(h, 0.0)

    h = jnp.dot(h.astype(jnp.bfloat16), w2_ref[...],
                preferred_element_type=jnp.float32) + b2_ref[...]
    h = jnp.maximum(h, 0.0)
    # dropout(p=0.5) -> identity in eval mode

    h = jnp.dot(h.astype(jnp.bfloat16), w3_ref[...],
                preferred_element_type=jnp.float32) + b3_ref[...]
    h = jnp.maximum(h, 0.0)

    h = jnp.dot(h.astype(jnp.bfloat16), w4_ref[...],
                preferred_element_type=jnp.float32) + b4_ref[...]
    h = jnp.maximum(h, 0.0)
    # dropout(p=0.5) -> identity in eval mode

    # Layer 5 (128 -> 1): skip the MXU entirely. Broadcast-multiply by the (1,128) weight
    # row on the VPU and reduce over lanes on the XLU; padded lanes are exactly zero.
    out = jnp.sum(h * w5_ref[...], axis=-1, keepdims=True) + b5_ref[...]
    o_ref[...] = out.astype(o_ref.dtype)


def _pad_cols(a, n):
    return jnp.pad(a, ((0, 0), (0, n - a.shape[1])))


def _pad_rows(a, n):
    return jnp.pad(a, ((0, n - a.shape[0]), (0, 0)))


def prepare_params(params):
    """One-time weight prep (hoist out of the per-call path).

    Zero-pads the narrow hidden widths (64, 32) to 128 so intermediates stay lane-dense,
    casts matmul weights to bf16 (biases stay f32), and reshapes the layer-5 weight to a
    lane-dense (1, 128) f32 row for the VPU mul + lane reduction. Math is exact: padded
    hidden units are relu(0 + 0) = 0 and feed zero-padded downstream weights."""
    (w1, b1), (w2, b2), (w3, b3), (w4, b4), (w5, b5) = params
    bf = lambda a: a.astype(jnp.bfloat16)
    f32 = lambda a: a.astype(jnp.float32)

    w3p, b3p = _pad_cols(w3, 128), _pad_cols(b3, 128)          # (128,64)->(128,128)
    w4p = _pad_cols(_pad_rows(w4, 128), 128)                   # (64,32) ->(128,128)
    b4p = _pad_cols(b4, 128)
    w5_row = _pad_cols(w5.reshape(1, -1), 128)                 # (32,1)  ->(1,128) f32

    return (bf(w1), f32(b1),
            bf(w2), f32(b2),
            bf(w3p), f32(b3p),
            bf(w4p), f32(b4p),
            f32(w5_row), f32(b5))


def _choose_tiling(B, max_tile_b):
    """Adaptive batch tile: minimal padding and an even, >=2-step grid for large B
    so the 'parallel' axis shards across both v7x TensorCores."""
    n_steps = _cdiv(B, max_tile_b)
    if n_steps == 1 and B > 512:
        n_steps = 2                       # engage both TCs on v7x
    if n_steps > 1 and n_steps % 2 == 1:
        n_steps += 1                      # balanced split across 2 TCs, less padding
    if n_steps == 1:
        tile_b = B                        # full-extent block (any B allowed)
    else:
        tile_b = _round_up(_cdiv(B, n_steps), 128)
        n_steps = _cdiv(B, tile_b)
    return tile_b, n_steps


def heuristic_model_forward(x, prepared, *, max_tile_b=2048):
    """x: (B, D) float32. prepared: output of prepare_params(). Returns (B, 1) float32."""
    B, D = x.shape
    w1, b1, w2, b2, w3, b3, w4, b4, w5, b5 = prepared

    tile_b, n_steps = _choose_tiling(B, max_tile_b)

    # Weights/biases: full-array blocks with a constant index_map -> VMEM-resident.
    resident = lambda a: pl.BlockSpec(a.shape, lambda i: (0,) * a.ndim)

    flops = 2 * B * (D * 256 + 256 * 128 + 128 * 128 + 128 * 128 + 128)
    bytes_accessed = (int(x.size) * 4 + B * 4
                      + sum(int(a.size) * a.dtype.itemsize
                            for a in (w1, b1, w2, b2, w3, b3, w4, b4, w5, b5)))

    out = pl.pallas_call(
        mlp_kernel,
        out_shape=jax.ShapeDtypeStruct((B, 1), jnp.float32),
        grid=(n_steps,),
        in_specs=[
            pl.BlockSpec((tile_b, D), lambda i: (i, 0)),
            resident(w1), resident(b1),
            resident(w2), resident(b2),
            resident(w3), resident(b3),
            resident(w4), resident(b4),
            resident(w5), resident(b5),
        ],
        out_specs=pl.BlockSpec((tile_b, 1), lambda i: (i, 0)),
        compiler_params=pltpu.CompilerParams(
            dimension_semantics=("parallel",)),
        cost_estimate=pl.CostEstimate(
            flops=int(flops), transcendentals=0, bytes_accessed=int(bytes_accessed)),
    )(x, w1, b1, w2, b2, w3, b3, w4, b4, w5, b5)

    return out


def init_params(key, input_dim):
    """Kaiming-uniform-ish init matching nn.Linear shapes.

    Weights stored transposed relative to PyTorch: (in_features, out_features).
    Biases kept 2D (1, out_features) for clean TPU broadcasting."""
    dims = [input_dim, 256, 128, 64, 32, 1]
    params = []
    for i in range(5):
        fan_in, fan_out = dims[i], dims[i + 1]
        key, kw, kb = jax.random.split(key, 3)
        bound = 1.0 / jnp.sqrt(jnp.float32(fan_in))
        w = jax.random.uniform(kw, (fan_in, fan_out), jnp.float32, -bound, bound)
        b = jax.random.uniform(kb, (1, fan_out), jnp.float32, -bound, bound)
        params.append((w, b))
    return params


def reference_forward(x, params):
    h = x
    for i, (w, b) in enumerate(params):
        h = h @ w + b
        if i < 4:
            h = jnp.maximum(h, 0.0)
    return h


if __name__ == "__main__":
    key = jax.random.PRNGKey(0)
    key, kx1, kx2 = jax.random.split(key, 3)

    input_dim = 32
    params = init_params(key, input_dim)
    prepared = prepare_params(params)          # hoisted: prepare once, reuse per call

    # Small demo shape (single grid step, full-extent block).
    B = 8
    x = jax.random.normal(kx1, (B, input_dim), jnp.float32)
    out = jax.block_until_ready(heuristic_model_forward(x, prepared))
    ref = reference_forward(x, params)
    assert out.shape == (B, 1)
    # bf16 matmul inputs vs f32 reference -> loosened tolerance.
    assert jnp.allclose(out, ref, atol=2e-2, rtol=2e-2)

    # Larger batch: exercises the forced 2-step parallel grid and the ragged tail
    # (partial last block, masked output writes) with no wrapper-side padding.
    B2 = 640
    x2 = jax.random.normal(kx2, (B2, input_dim), jnp.float32)
    out2 = jax.block_until_ready(heuristic_model_forward(x2, prepared))
    ref2 = reference_forward(x2, params)
    assert out2.shape == (B2, 1)
    assert jnp.allclose(out2, ref2, atol=2e-2, rtol=2e-2)

    print("KERNEL_OK")
</pallas_src>

<mosaic_0001>
module attributes {stable_mosaic.version = 11 : i64} {
  func.func @mlp_kernel(%arg0: i32, %arg1: memref<8x32xf32, #tpu.memory_space<vmem>>, %arg2: memref<32x256xbf16, #tpu.memory_space<vmem>>, %arg3: memref<1x256xf32, #tpu.memory_space<vmem>>, %arg4: memref<256x128xbf16, #tpu.memory_space<vmem>>, %arg5: memref<1x128xf32, #tpu.memory_space<vmem>>, %arg6: memref<128x128xbf16, #tpu.memory_space<vmem>>, %arg7: memref<1x128xf32, #tpu.memory_space<vmem>>, %arg8: memref<128x128xbf16, #tpu.memory_space<vmem>>, %arg9: memref<1x128xf32, #tpu.memory_space<vmem>>, %arg10: memref<1x128xf32, #tpu.memory_space<vmem>>, %arg11: memref<1x1xf32, #tpu.memory_space<vmem>>, %arg12: memref<8x1xf32, #tpu.memory_space<vmem>>) attributes {dimension_semantics = [#tpu.dimension_semantics<parallel>], iteration_bounds = array<i64: 1>, scalar_prefetch = 0 : i64, scratch_operands = 0 : i64, tpu.core_type = #tpu.core_type<tc>, window_params = [{transform_indices = @transform_0, window_bounds = array<i64: 8, 32>}, {pipeline_mode = #tpu.pipeline_mode<synchronous>, transform_indices = @transform_1, window_bounds = array<i64: 32, 256>}, {pipeline_mode = #tpu.pipeline_mode<synchronous>, transform_indices = @transform_2, window_bounds = array<i64: 1, 256>}, {pipeline_mode = #tpu.pipeline_mode<synchronous>, transform_indices = @transform_3, window_bounds = array<i64: 256, 128>}, {pipeline_mode = #tpu.pipeline_mode<synchronous>, transform_indices = @transform_4, window_bounds = array<i64: 1, 128>}, {pipeline_mode = #tpu.pipeline_mode<synchronous>, transform_indices = @transform_5, window_bounds = array<i64: 128, 128>}, {pipeline_mode = #tpu.pipeline_mode<synchronous>, transform_indices = @transform_6, window_bounds = array<i64: 1, 128>}, {pipeline_mode = #tpu.pipeline_mode<synchronous>, transform_indices = @transform_7, window_bounds = array<i64: 128, 128>}, {pipeline_mode = #tpu.pipeline_mode<synchronous>, transform_indices = @transform_8, window_bounds = array<i64: 1, 128>}, {pipeline_mode = #tpu.pipeline_mode<synchronous>, transform_indices = @transform_9, window_bounds = array<i64: 1, 128>}, {pipeline_mode = #tpu.pipeline_mode<synchronous>, transform_indices = @transform_10, window_bounds = array<i64: 1, 1>}, {transform_indices = @transform_11, window_bounds = array<i64: 8, 1>}]} {
    %c0 = arith.constant 0 : index
    %c0_0 = arith.constant 0 : index
    %0 = vector.load %arg1[%c0, %c0_0] : memref<8x32xf32, #tpu.memory_space<vmem>>, vector<8x32xf32>
    %1 = arith.truncf %0 : vector<8x32xf32> to vector<8x32xbf16>
    %c0_1 = arith.constant 0 : index
    %c0_2 = arith.constant 0 : index
    %2 = vector.load %arg2[%c0_1, %c0_2] : memref<32x256xbf16, #tpu.memory_space<vmem>>, vector<32x256xbf16>
    %cst = arith.constant dense<0.000000e+00> : vector<8x256xf32>
    %3 = tpu.matmul %1, %2, %cst {dimension_numbers = #tpu.dot_dimension_numbers<[1], [0], [0], [1], [0, 0, 1, 1], [], []>} : vector<8x32xbf16>, vector<32x256xbf16>, vector<8x256xf32> -> vector<8x256xf32>
    %c0_3 = arith.constant 0 : index
    %c0_4 = arith.constant 0 : index
    %4 = vector.load %arg3[%c0_3, %c0_4] : memref<1x256xf32, #tpu.memory_space<vmem>>, vector<1x256xf32>
    %5 = vector.broadcast %4 : vector<1x256xf32> to vector<8x256xf32>
    %6 = arith.addf %3, %5 : vector<8x256xf32>
    %cst_5 = arith.constant 0.000000e+00 : f32
    %7 = vector.broadcast %cst_5 : f32 to vector<8x256xf32>
    %8 = arith.maximumf %6, %7 : vector<8x256xf32>
    %9 = arith.truncf %8 : vector<8x256xf32> to vector<8x256xbf16>
    %c0_6 = arith.constant 0 : index
    %c0_7 = arith.constant 0 : index
    %10 = vector.load %arg4[%c0_6, %c0_7] : memref<256x128xbf16, #tpu.memory_space<vmem>>, vector<256x128xbf16>
    %cst_8 = arith.constant dense<0.000000e+00> : vector<8x128xf32>
    %11 = tpu.matmul %9, %10, %cst_8 {dimension_numbers = #tpu.dot_dimension_numbers<[1], [0], [0], [1], [0, 0, 1, 1], [], []>} : vector<8x256xbf16>, vector<256x128xbf16>, vector<8x128xf32> -> vector<8x128xf32>
    %c0_9 = arith.constant 0 : index
    %c0_10 = arith.constant 0 : index
    %12 = vector.load %arg5[%c0_9, %c0_10] : memref<1x128xf32, #tpu.memory_space<vmem>>, vector<1x128xf32>
    %13 = vector.broadcast %12 : vector<1x128xf32> to vector<8x128xf32>
    %14 = arith.addf %11, %13 : vector<8x128xf32>
    %cst_11 = arith.constant 0.000000e+00 : f32
    %15 = vector.broadcast %cst_11 : f32 to vector<8x128xf32>
    %16 = arith.maximumf %14, %15 : vector<8x128xf32>
    %17 = arith.truncf %16 : vector<8x128xf32> to vector<8x128xbf16>
    %c0_12 = arith.constant 0 : index
    %c0_13 = arith.constant 0 : index
    %18 = vector.load %arg6[%c0_12, %c0_13] : memref<128x128xbf16, #tpu.memory_space<vmem>>, vector<128x128xbf16>
    %cst_14 = arith.constant dense<0.000000e+00> : vector<8x128xf32>
    %19 = tpu.matmul %17, %18, %cst_14 {dimension_numbers = #tpu.dot_dimension_numbers<[1], [0], [0], [1], [0, 0, 1, 1], [], []>} : vector<8x128xbf16>, vector<128x128xbf16>, vector<8x128xf32> -> vector<8x128xf32>
    %c0_15 = arith.constant 0 : index
    %c0_16 = arith.constant 0 : index
    %20 = vector.load %arg7[%c0_15, %c0_16] : memref<1x128xf32, #tpu.memory_space<vmem>>, vector<1x128xf32>
    %21 = vector.broadcast %20 : vector<1x128xf32> to vector<8x128xf32>
    %22 = arith.addf %19, %21 : vector<8x128xf32>
    %cst_17 = arith.constant 0.000000e+00 : f32
    %23 = vector.broadcast %cst_17 : f32 to vector<8x128xf32>
    %24 = arith.maximumf %22, %23 : vector<8x128xf32>
    %25 = arith.truncf %24 : vector<8x128xf32> to vector<8x128xbf16>
    %c0_18 = arith.constant 0 : index
    %c0_19 = arith.constant 0 : index
    %26 = vector.load %arg8[%c0_18, %c0_19] : memref<128x128xbf16, #tpu.memory_space<vmem>>, vector<128x128xbf16>
    %cst_20 = arith.constant dense<0.000000e+00> : vector<8x128xf32>
    %27 = tpu.matmul %25, %26, %cst_20 {dimension_numbers = #tpu.dot_dimension_numbers<[1], [0], [0], [1], [0, 0, 1, 1], [], []>} : vector<8x128xbf16>, vector<128x128xbf16>, vector<8x128xf32> -> vector<8x128xf32>
    %c0_21 = arith.constant 0 : index
    %c0_22 = arith.constant 0 : index
    %28 = vector.load %arg9[%c0_21, %c0_22] : memref<1x128xf32, #tpu.memory_space<vmem>>, vector<1x128xf32>
    %29 = vector.broadcast %28 : vector<1x128xf32> to vector<8x128xf32>
    %30 = arith.addf %27, %29 : vector<8x128xf32>
    %cst_23 = arith.constant 0.000000e+00 : f32
    %31 = vector.broadcast %cst_23 : f32 to vector<8x128xf32>
    %32 = arith.maximumf %30, %31 : vector<8x128xf32>
    %c0_24 = arith.constant 0 : index
    %c0_25 = arith.constant 0 : index
    %33 = vector.load %arg10[%c0_24, %c0_25] : memref<1x128xf32, #tpu.memory_space<vmem>>, vector<1x128xf32>
    %34 = vector.broadcast %33 : vector<1x128xf32> to vector<8x128xf32>
    %35 = arith.mulf %32, %34 : vector<8x128xf32>
    %cst_26 = arith.constant dense<0.000000e+00> : vector<8xf32>
    %36 = vector.multi_reduction <add>, %35, %cst_26 [1] : vector<8x128xf32> to vector<8xf32>
    %37 = vector.shape_cast %36 : vector<8xf32> to vector<8x1xf32>
    %c0_27 = arith.constant 0 : index
    %c0_28 = arith.constant 0 : index
    %38 = vector.load %arg11[%c0_27, %c0_28] : memref<1x1xf32, #tpu.memory_space<vmem>>, vector<1x1xf32>
    %39 = vector.broadcast %38 : vector<1x1xf32> to vector<8x1xf32>
    %40 = arith.addf %37, %39 : vector<8x1xf32>
    %c0_29 = arith.constant 0 : index
    %c0_30 = arith.constant 0 : index
    %41 = vector.load %arg12[%c0_29, %c0_30] : memref<8x1xf32, #tpu.memory_space<vmem>>, vector<8x1xf32>
    tpu.vector_store %arg12[%c0_29, %c0_30], %40 {strides = array<i32>} : memref<8x1xf32, #tpu.memory_space<vmem>>, vector<8x1xf32>,
    return
  }
  func.func @transform_0(%arg0: i32) -> (i32, i32) {
    %c0_i32 = arith.constant 0 : i32
    %c0_i32_0 = arith.constant 0 : i32
    return %arg0, %c0_i32 : i32, i32
  }
  func.func @transform_1(%arg0: i32) -> (i32, i32) {
    %c0_i32 = arith.constant 0 : i32
    %c0_i32_0 = arith.constant 0 : i32
    %c0_i32_1 = arith.constant 0 : i32
    return %c0_i32, %c0_i32_0 : i32, i32
  }
  func.func @transform_2(%arg0: i32) -> (i32, i32) {
    %c0_i32 = arith.constant 0 : i32
    %c0_i32_0 = arith.constant 0 : i32
    %c0_i32_1 = arith.constant 0 : i32
    return %c0_i32, %c0_i32_0 : i32, i32
  }
  func.func @transform_3(%arg0: i32) -> (i32, i32) {
    %c0_i32 = arith.constant 0 : i32
    %c0_i32_0 = arith.constant 0 : i32
    %c0_i32_1 = arith.constant 0 : i32
    return %c0_i32, %c0_i32_0 : i32, i32
  }
  func.func @transform_4(%arg0: i32) -> (i32, i32) {
    %c0_i32 = arith.constant 0 : i32
    %c0_i32_0 = arith.constant 0 : i32
    %c0_i32_1 = arith.constant 0 : i32
    return %c0_i32, %c0_i32_0 : i32, i32
  }
  func.func @transform_5(%arg0: i32) -> (i32, i32) {
    %c0_i32 = arith.constant 0 : i32
    %c0_i32_0 = arith.constant 0 : i32
    %c0_i32_1 = arith.constant 0 : i32
    return %c0_i32, %c0_i32_0 : i32, i32
  }
  func.func @transform_6(%arg0: i32) -> (i32, i32) {
    %c0_i32 = arith.constant 0 : i32
    %c0_i32_0 = arith.constant 0 : i32
    %c0_i32_1 = arith.constant 0 : i32
    return %c0_i32, %c0_i32_0 : i32, i32
  }
  func.func @transform_7(%arg0: i32) -> (i32, i32) {
    %c0_i32 = arith.constant 0 : i32
    %c0_i32_0 = arith.constant 0 : i32
    %c0_i32_1 = arith.constant 0 : i32
    return %c0_i32, %c0_i32_0 : i32, i32
  }
  func.func @transform_8(%arg0: i32) -> (i32, i32) {
    %c0_i32 = arith.constant 0 : i32
    %c0_i32_0 = arith.constant 0 : i32
    %c0_i32_1 = arith.constant 0 : i32
    return %c0_i32, %c0_i32_0 : i32, i32
  }
  func.func @transform_9(%arg0: i32) -> (i32, i32) {
    %c0_i32 = arith.constant 0 : i32
    %c0_i32_0 = arith.constant 0 : i32
    %c0_i32_1 = arith.constant 0 : i32
    return %c0_i32, %c0_i32_0 : i32, i32
  }
  func.func @transform_10(%arg0: i32) -> (i32, i32) {
    %c0_i32 = arith.constant 0 : i32
    %c0_i32_0 = arith.constant 0 : i32
    %c0_i32_1 = arith.constant 0 : i32
    return %c0_i32, %c0_i32_0 : i32, i32
  }
  func.func @transform_11(%arg0: i32) -> (i32, i32) {
    %c0_i32 = arith.constant 0 : i32
    %c0_i32_0 = arith.constant 0 : i32
    return %arg0, %c0_i32 : i32, i32
  }
}

</mosaic_0001>

<bundles_post_ra>
// kernel: tpu_custom_call.1
= control target key start
LH: loop header
LB: loop body
LE: loop exit
PB: predicated region body
PF: predicated region fallthrough
CT: control target
= control target key end

     0   :  { %s956_s0 = inlined_call_operand.hbm [shape: f32[8,32], index: 0, kind: input, shape index: {}]   ;;  %s957_s1 = inlined_call_operand.hbm [shape: bf16[32,256], index: 1, kind: input, shape index: {}]   ;;  %s958_s2 = inlined_call_operand.vmem [shape: f32[1,256], index: 2, kind: input, shape index: {}]   ;;  %s959_s3 = inlined_call_operand.hbm [shape: bf16[256,128], index: 3, kind: input, shape index: {}]   ;;  %s960_s4 = inlined_call_operand.vmem [shape: f32[1,128], index: 4, kind: input, shape index: {}]   ;;  %s961_s5 = inlined_call_operand.hbm [shape: bf16[128,128], index: 5, kind: input, shape index: {}]   ;;  %s962_s6 = inlined_call_operand.vmem [shape: f32[1,128], index: 6, kind: input, shape index: {}]   ;;  %s963_s7 = inlined_call_operand.hbm [shape: bf16[128,128], index: 7, kind: input, shape index: {}]   ;;  %s964_s8 = inlined_call_operand.vmem [shape: f32[1,128], index: 8, kind: input, shape index: {}]   ;;  %s965_s9 = inlined_call_operand.vmem [shape: f32[1,128], index: 9, kind: input, shape index: {}]   ;;  %s966_s10 = inlined_call_operand.<no memory space> [shape: f32[1,1], index: 10, kind: input, shape index: {}]   ;;  %s967_s11 = inlined_call_operand.vmem [shape: f32[8,1], index: 11, kind: output, shape index: {}]  }
   0x1   :  { %v16_v0 = vstv %s966_s10 }
   0x2   :  { %17 = vst [vmem:[#allocation2] sm:$0x1] %v16_v0 }
   0x3   :  { %18 = vsyncpa [#allocation4], 0 }
   0x4   :  { %19 = vsyncpa [#allocation6], 0  ;;  %s36_s21 = sshll.u32 %s957_s1, 4  ;;  %s37_s21 = int_to_ptr.hbm [resolvable:$true] %s36_s21 }
   0x5   :  { %20 = vsyncpa [#allocation9], 0  ;;  %s851_s22 = smov [#allocation5]   ;;  %s852_s24 = smov 128  }
   0x6   :  { %s38_s23 = sshll.u32 %s851_s22, 4  ;;  %s853_s25 = smov 8   ;;  %s39_s23 = int_to_ptr.vmem [resolvable:$true] %s38_s23 }
   0x7   :  { %44 = dma.hbm_to_vmem [thread:$0]  %s37_s21, 512, %s39_s23, [#allocation6], %s852_s24, %s852_s24, %s853_s25  }
   0x8   :  { %s66_s28 = sshll.u32 %s961_s5, 4  ;;  %s854_s10 = smov [#allocation8]   ;;  %s67_s28 = int_to_ptr.hbm [resolvable:$true] %s66_s28 }
   0x9   :  { %s68_s29 = sshll.u32 %s854_s10, 4  ;;  %s26_s13 = sshll.u32 %s956_s0, 4  ;;  %s69_s29 = int_to_ptr.vmem [resolvable:$true] %s68_s29  ;;  %s27_s13 = int_to_ptr.hbm [resolvable:$true] %s26_s13 }
   0xa   :  { %s855_s1 = smov 64   ;;  %s856_s14 = smov 4  }
   0xb   :  { %74 = dma.hbm_to_vmem [thread:$0]  %s67_s28, 1024, %s69_s29, [#allocation9], %s855_s1, %s855_s1, %s856_s14  }
   0xc   :  { %s51_s17 = sshll.u32 %s959_s3, 4  ;;  %s857_s18 = smov [#allocation3]   ;;  %s52_s17 = int_to_ptr.hbm [resolvable:$true] %s51_s17 }
   0xd   :  { %s28_s19 = sshll.u32 %s857_s18, 4  ;;  %s858_s5 = smov [#allocation7]   ;;  %s29_s19 = int_to_ptr.vmem [resolvable:$true] %s28_s19 }
   0xe   :  { %31 = dma.hbm_to_vmem [thread:$0]  %s27_s13, 128, %s29_s19, [#allocation4]  }
   0xf   :  { %s53_s20 = sshll.u32 %s858_s5, 4  ;;  %s81_s0 = sshll.u32 %s963_s7, 4  ;;  %s54_s20 = int_to_ptr.vmem [resolvable:$true] %s53_s20  ;;  %s82_s0 = int_to_ptr.hbm [resolvable:$true] %s81_s0 }
  0x10   :  { %59 = dma.hbm_to_vmem [thread:$0]  %s52_s17, 2048, %s54_s20, [#allocation6], %s855_s1, %s855_s1, %s856_s14  }
  0x11   :  { %s859_s23 = smov [#allocation10]  }
  0x12   :  { %s83_s24 = sshll.u32 %s859_s23, 4  ;;  %s84_s24 = int_to_ptr.vmem [resolvable:$true] %s83_s24 }
  0x13   :  { %89 = dma.hbm_to_vmem [thread:$0]  %s82_s0, 1024, %s84_s24, [#allocation9], %s855_s1, %s855_s1, %s856_s14  }
  0x14   :  { %845 = dma.done.wait [#allocation4], 128  }
  0x15   :  { %846 = vsyncadd [#allocation4], 4294967168 }
  0x16   :  { %847 = dma.done.wait [#allocation6], 2560  }
  0x17   :  { %848 = vsyncadd [#allocation6], 4294964736 }
  0x18   :  { %849 = dma.done.wait [#allocation9], 2048  }
  0x19   :  { %850 = vsyncadd [#allocation9], 4294965248  ;;  %v539_v1 = vld [vmem:[#allocation5 + $0x10] sm:$0xf]  ;;  %v678_v2 = vld [vmem:[#allocation5 + $0x14] sm:$0xf0] }
  0x1a   :  { %v677_v3 = vld [vmem:[#allocation5 + $0x14] sm:$0xf]  ;;  %v540_v4 = vor.u32 %v678_v2, %v539_v1  ;;  %v541_v5 = vld [vmem:[#allocation5 + $0x18] sm:$0xf0]  ;;  %v531_v6 = vld [vmem:[#allocation5] sm:$0xf] }
  0x1b   :  { %v676_v7 = vld [vmem:[#allocation5 + $0x4] sm:$0xf0]  ;;  %v544_v8 = vor.u32 %v677_v3, %v541_v5  ;;  %v675_v9 = vld [vmem:[#allocation5 + $0x4] sm:$0xf]  ;;  %v533_v10 = vld [vmem:[#allocation5 + $0x8] sm:$0xf0] }
  0x1c   :  { %159 = vmatpush.bf16.msra.mxu0 %v540_v4  ;;  %v532_v11 = vor.u32 %v676_v7, %v531_v6  ;;  %v117_v12 = vld [vmem:[#allocation3] sm:$0xff]  ;;  %v536_v15 = vor.u32 %v675_v9, %v533_v10  ;;  %v685_v16 = vld [vmem:[#allocation7 + $0x30] sm:$0xff]  ;;  %vm149_vm0 = vcmask 261120   ;;  %v684_v19 = vld [vmem:[#allocation7 + $0x28] sm:$0xff]  ;;  %vm520_vm1 = vcmask 7168  }
  0x1d   :  { %v686_v13 = vld [vmem:[#allocation7 + $0x38] sm:$0xff]  ;;  %172 = vmatpush.bf16.msra.mxu1 %v544_v8  ;;  %v693_v17 = vld [vmem:[#allocation7 + $0x70] sm:$0xff]  ;;  %v118_v18 = vpack.c.bf16 %v117_v12, %v117_v12  ;;  %v692_v20 = vld [vmem:[#allocation7 + $0x68] sm:$0xff] }
  0x1e   :  { %v694_v14 = vld [vmem:[#allocation7 + $0x78] sm:$0xff]  ;;  %315 = vmatpush.bf16.msra.mxu2 %v686_v13  ;;  %v683_v21 = vld [vmem:[#allocation7 + $0x20] sm:$0xff]  ;;  %v681_v25 = vld [vmem:[#allocation7 + $0x10] sm:$0xff] }
  0x1f   :  { %328 = vmatpush.bf16.msra.mxu3 %v694_v14  ;;  %v691_v22 = vld [vmem:[#allocation7 + $0x60] sm:$0xff]  ;;  %v682_v23 = vld [vmem:[#allocation7 + $0x18] sm:$0xff]  ;;  %v689_v26 = vld [vmem:[#allocation7 + $0x50] sm:$0xff] }
  0x20   :  { %160 = vmatpush.bf16.msra.mxu0 %v532_v11  ;;  %v690_v24 = vld [vmem:[#allocation7 + $0x58] sm:$0xff]  ;;  %v680_v27 = vld [vmem:[#allocation7 + $0x8] sm:$0xff]  ;;  %v679_v29 = vld [vmem:[#allocation7] sm:$0xff] }
  0x21   :  { %173 = vmatpush.bf16.msra.mxu1 %v536_v15  ;;  %v688_v28 = vld [vmem:[#allocation7 + $0x48] sm:$0xff]  ;;  %v687_v30 = vld [vmem:[#allocation7 + $0x40] sm:$0xff]  ;;  %v702_v31 = vld [vmem:[#allocation8 + $0x38] sm:$0xff] }
  0x22   :  { %316 = vmatpush.bf16.msra.mxu2 %v685_v16  ;;  %v701_v32 = vld [vmem:[#allocation8 + $0x30] sm:$0xff]  ;;  %v700_v33 = vld [vmem:[#allocation8 + $0x28] sm:$0xff]  ;;  %v699_v34 = vld [vmem:[#allocation8 + $0x20] sm:$0xff] }
  0x23   :  { %329 = vmatpush.bf16.msra.mxu3 %v693_v17  ;;  %545 = vmatmul.msk.bf16.vlgmr.msra.gmra.mxu0 %vm149_vm0, %v118_v18  ;;  %v698_v35 = vld [vmem:[#allocation8 + $0x18] sm:$0xff]  ;;  %v697_v37 = vld [vmem:[#allocation8 + $0x10] sm:$0xff]  ;;  %v696_v50 = vld [vmem:[#allocation8 + $0x8] sm:$0xff] }
  0x24   :  { %546 = vmatmul.msk.bf16.vlgmr.msra.gmra.mxu1 %vm149_vm0, %v118_v18  ;;  %411 = vmatpush.bf16.msrb.mxu0 %v702_v31  ;;  %v123_v36 = vld [vmem:[%s958_s2] sm:$0x3]  ;;  %v695_v51 = vld [vmem:[#allocation8] sm:$0xff]  ;;  %v708_v54 = vld [vmem:[#allocation10 + $0x28] sm:$0xff] }
  0x25   :  { %v125_v38 = vperm.slane %v123_v36, 0  ;;  %v126_v39 = vperm.slane %v123_v36, 1  ;;  %v710_v52 = vld [vmem:[#allocation10 + $0x38] sm:$0xff]  ;;  %v709_v53 = vld [vmem:[#allocation10 + $0x30] sm:$0xff]  ;;  %v707_v55 = vld [vmem:[#allocation10 + $0x20] sm:$0xff] }
  0x26   :  { %317 = vmatpush.bf16.msra.mxu2 %v684_v19  ;;  %494 = vmatpush.bf16.msrb.mxu1 %v710_v52  ;;  %v706_v56 = vld [vmem:[#allocation10 + $0x18] sm:$0xff]  ;;  %v705_v57 = vld [vmem:[#allocation10 + $0x10] sm:$0xff]  ;;  %v704_v3 = vld [vmem:[#allocation10 + $0x8] sm:$0xff] }
  0x27   :  { %330 = vmatpush.bf16.msra.mxu3 %v692_v20  ;;  %v720_v58 = vld [vmem:[%s960_s4] ss:$0 sm:$0xff]  ;;  %v703_v4 = vld [vmem:[#allocation10] sm:$0xff] }
  0x28   :  { %412 = vmatpush.bf16.msrb.mxu0 %v701_v32  ;;  %v721_v5 = vld [vmem:[%s962_s6] ss:$0 sm:$0xff] }
  0x29   :  { %v722_v11 = vld [vmem:[%s964_s8] ss:$0 sm:$0xff] }
  0x2a   :  { %318 = vmatpush.bf16.msra.mxu2 %v683_v21  ;;  %495 = vmatpush.bf16.msrb.mxu1 %v709_v53  ;;  %v723_v14 = vld [vmem:[%s965_s9] ss:$0 sm:$0xff] }
  0x2b   :  { %331 = vmatpush.bf16.msra.mxu3 %v691_v22  ;;  %v724_v18 = vld [vmem:[#allocation2] ss:$0 sm:$0xff] }
  0x2c   :  { %413 = vmatpush.bf16.msrb.mxu0 %v700_v33 }
  0x2e   :  { %319 = vmatpush.bf16.msra.mxu2 %v682_v23  ;;  %496 = vmatpush.bf16.msrb.mxu1 %v708_v54 }
  0x2f   :  { %332 = vmatpush.bf16.msra.mxu3 %v690_v24 }
  0x30   :  { %414 = vmatpush.bf16.msrb.mxu0 %v699_v34 }
  0x32   :  { %320 = vmatpush.bf16.msra.mxu2 %v681_v25  ;;  %497 = vmatpush.bf16.msrb.mxu1 %v707_v55 }
  0x33   :  { %333 = vmatpush.bf16.msra.mxu3 %v689_v26 }
  0x34   :  { %415 = vmatpush.bf16.msrb.mxu0 %v698_v35 }
  0x36   :  { %321 = vmatpush.bf16.msra.mxu2 %v680_v27  ;;  %498 = vmatpush.bf16.msrb.mxu1 %v706_v56 }
  0x37   :  { %334 = vmatpush.bf16.msra.mxu3 %v688_v28 }
  0x38   :  { %416 = vmatpush.bf16.msrb.mxu0 %v697_v37 }
  0x3a   :  { %322 = vmatpush.bf16.msra.mxu2 %v679_v29  ;;  %499 = vmatpush.bf16.msrb.mxu1 %v705_v57 }
  0x3b   :  { %335 = vmatpush.bf16.msra.mxu3 %v687_v30 }
  0x3c   :  { %417 = vmatpush.bf16.msrb.mxu0 %v696_v50 }
  0x3e   :  { %500 = vmatpush.bf16.msrb.mxu1 %v704_v3 }
  0x40   :  { %418 = vmatpush.bf16.msrb.mxu0 %v695_v51 }
  0x42   :  { %501 = vmatpush.bf16.msrb.mxu1 %v703_v4 }
  0xa0   :  { %v162_v40 = vpop.f32.mrf.mxu0 }
  0xa1   :  { %v163_v41 = vadd.f32 %v162_v40, %v125_v38  ;;  %v175_v42 = vpop.f32.mrf.mxu1 }
  0xa2   :  { %v176_v43 = vadd.f32 %v175_v42, %v126_v39 }
  0xa3   :  { %v179_v44 = vmax.f32 %v163_v41, 0.0 }
  0xa4   :  { %v180_v45 = vmax.f32 %v176_v43, 0.0 }
  0xa5   :  { %v181_v46 = vpack.c.bf16 %v179_v44, %v179_v44 }
  0xa6   :  { %v182_v47 = vpack.c.bf16 %v180_v45, %v180_v45 }
  0xa7   :  { %323 = vmatmul.bf16.vlgmr.msra.gmra.mxu2 %v181_v46 }
  0xa8   :  { %336 = vmatmul.bf16.vlgmr.msra.gmra.mxu3 %v182_v47  ;;  %v164_v48 = vpop.f32.mrf.mxu0 }
  0xa9   :  { %v177_v49 = vpop.f32.mrf.mxu1 }
 0x12a   :  { %v324_v59 = vpop.f32.mrf.mxu2 }
 0x12b   :  { %v325_v60 = vadd.f32 %v720_v58, %v324_v59  ;;  %v337_v61 = vpop.f32.mrf.mxu3 }
 0x12d   :  { %v338_v62 = vadd.f32 %v337_v61, %v325_v60 }
 0x12f   :  { %v341_v63 = vmax.f32 %v338_v62, 0.0 }
 0x131   :  { %v342_v0 = vpack.c.bf16 %v341_v63, %v341_v63 }
 0x132   :  { %v326_v1 = vpop.f32.mrf.mxu2 }
 0x133   :  { %v339_v2 = vpop.f32.mrf.mxu3  ;;  %419 = vmatmul.bf16.vlgmr.msrb.gmra.mxu0 %v342_v0 }
 0x1b0   :  { %v420_v6 = vpop.f32.mrf.mxu0 }
 0x1b1   :  { %v421_v7 = vadd.f32 %v721_v5, %v420_v6 }
 0x1b3   :  { %v424_v8 = vmax.f32 %v421_v7, 0.0 }
 0x1b5   :  { %v425_v9 = vpack.c.bf16 %v424_v8, %v424_v8 }
 0x1b7   :  { %502 = vmatmul.bf16.vlgmr.msrb.gmra.mxu1 %v425_v9 }
 0x1b8   :  { %v422_v10 = vpop.f32.mrf.mxu0 }
 0x234   :  { %v503_v12 = vpop.f32.mrf.mxu1 }
 0x235   :  { %v504_v13 = vadd.f32 %v722_v11, %v503_v12 }
 0x237   :  { %v507_v15 = vmax.f32 %v504_v13, 0.0 }
 0x239   :  { %v512_v16 = vmul.f32 %v723_v14, %v507_v15 }
 0x23b   :  { %513 = vadd.xlane.f32.xlu0 %v512_v16 }
 0x23c   :  { %v505_v17 = vpop.f32.mrf.mxu1 }
 0x2ae   :  { %v514_v19 = vpop.xlane.xlu0 %513 }
 0x2af   :  { %v519_v20 = vadd.f32 %v724_v18, %v514_v19 }
 0x2b1   :  { %521 = vst.msk [vmem:[%s967_s11] sm:$0xff] %vm520_vm1, %v519_v20 }
 0x2b2   :  { %526 = vsyncpa [#allocation4], 1 }
 0x2b3   :  { %527 = vsyncpa [#allocation6], 1 }
 0x2b4   :  { %528 = vsyncpa [#allocation9], 1 }

</bundles_post_ra>
